<compile_context>
chip_gen: v6e
topology: v6e:2x2x1
jax: 0.10.0
libtpu: 0.0.40
codegen_flags: <defaults>
</compile_context>

<pallas_src>
import functools

import jax
import jax.numpy as jnp
from jax.experimental import pallas as pl
from jax.experimental.pallas import tpu as pltpu


def _round_up(x, m):
    return ((x + m - 1) // m) * m


def _patch_embed_kernel(x_ref, w_ref, b_ref, g_ref, beta_ref, o_ref, *,
                        eps, inv_true_d):
    # x_ref:   (TM, K)  bf16 patch vectors
    # w_ref:   (K, Dp)  bf16 flattened conv weight (zero-padded beyond true D)
    # b_ref / g_ref / beta_ref: (1, Dp) f32 conv bias / LN gamma / LN beta
    #                            (zero-padded beyond true D)
    # o_ref:   (TM, Dp)
    y = jnp.dot(x_ref[...], w_ref[...], preferred_element_type=jnp.float32)
    y = y + b_ref[...]                       # conv bias (padded lanes stay 0)

    # LayerNorm statistics over the TRUE embed_dim: padded lanes contribute 0
    # to both sum(y) and sum(y*y), so dividing by the true D is exact.
    sum_y = jnp.sum(y, axis=-1, keepdims=True)
    mean = sum_y * inv_true_d
    sum_y2 = jnp.sum(y * y, axis=-1, keepdims=True)
    var = jnp.maximum(sum_y2 * inv_true_d - mean * mean, 0.0)
    inv_std = jax.lax.rsqrt(var + eps)

    # Padded lanes: (0 - mean) * inv_std * gamma(=0) + beta(=0) == 0.
    o_ref[...] = ((y - mean) * inv_std * g_ref[...] + beta_ref[...]).astype(o_ref.dtype)


def _pick_tile_m(M, K, Dp, *, requested=None, preferred=512,
                 vmem_budget_bytes=24 << 20):
    """Row tile sized against an explicit per-step VMEM budget (v7x-safe)."""
    if requested is not None:
        assert requested % 8 == 0, "tile_m must be a multiple of 8 (sublane)"
        return requested
    # Per-step VMEM: double-buffered bf16 LHS + double-buffered f32 output,
    # plus the (constant-index) bf16 weight and f32 param rows.
    fixed = 2 * K * Dp * 2 + 6 * Dp * 4
    per_row = 2 * K * 2 + 2 * Dp * 4
    max_rows = max(8, (vmem_budget_bytes - fixed) // per_row)
    t = min(preferred, max_rows, _round_up(M, 8))
    return max(8, (t // 8) * 8)


def patch_embeddings(x_nchw, conv_w, conv_b, ln_gamma, ln_beta, patch_size, *,
                     eps=1e-5, tile_m=None, compute_dtype=jnp.bfloat16):
    """x_nchw: (B, C, H, W); conv_w: (D, C, ph, pw); returns (B, L, D)."""
    B, C, H, W = x_nchw.shape
    ph, pw = patch_size
    D = conv_w.shape[0]
    Hp, Wp = H // ph, W // pw
    L = Hp * Wp
    K = C * ph * pw
    M = B * L
    Dp = _round_up(D, 128)            # lane-dense output width
    out_dtype = x_nchw.dtype

    # --- patch extraction (host glue) ---------------------------------------
    # Cast to bf16 *before* the patch transpose so the one extra HBM pass it
    # costs is done at half width; the same bf16 tensor then feeds the MXU.
    # TODO(synk): fold patch extraction into the kernel (index_map over the
    # NCHW array + in-VMEM reorder) to remove this extra HBM read+write.
    x16 = x_nchw.astype(compute_dtype)
    patches = x16.reshape(B, C, Hp, ph, Wp, pw)
    patches = patches.transpose(0, 2, 4, 1, 3, 5)        # (B, Hp, Wp, C, ph, pw)
    patches = patches.reshape(M, K)

    # Flattened conv weight in matching (C, ph, pw) order, zero-padded to Dp.
    w_mat = conv_w.reshape(D, K).T                        # (K, D)
    w_mat = jnp.pad(w_mat, ((0, 0), (0, Dp - D))).astype(compute_dtype)
    b_row = jnp.pad(conv_b.reshape(1, D), ((0, 0), (0, Dp - D))).astype(jnp.float32)
    g_row = jnp.pad(ln_gamma.reshape(1, D), ((0, 0), (0, Dp - D))).astype(jnp.float32)
    beta_row = jnp.pad(ln_beta.reshape(1, D), ((0, 0), (0, Dp - D))).astype(jnp.float32)

    # --- row tiling ----------------------------------------------------------
    tm = _pick_tile_m(M, K, Dp, requested=tile_m)
    M_pad = _round_up(M, tm)
    if M_pad != M:
        patches = jnp.pad(patches, ((0, M_pad - M), (0, 0)))
    grid = (M_pad // tm,)

    # Explicit VMEM limit (v7x has only 64 MiB physical / 32 MiB scoped).
    per_step_bytes = (2 * tm * K * 2          # double-buffered bf16 LHS
                      + 2 * tm * Dp * 4       # double-buffered f32 output
                      + 2 * K * Dp * 2        # bf16 weight (constant index)
                      + 6 * Dp * 4)           # bias / gamma / beta rows
    vmem_limit = int(min(max(2 * per_step_bytes, 16 << 20), 64 << 20))

    kernel = functools.partial(_patch_embed_kernel, eps=float(eps),
                               inv_true_d=1.0 / float(D))
    out = pl.pallas_call(
        kernel,
        out_shape=jax.ShapeDtypeStruct((M_pad, Dp), out_dtype),
        grid_spec=pltpu.PrefetchScalarGridSpec(
            num_scalar_prefetch=0,
            grid=grid,
            in_specs=[
                pl.BlockSpec((tm, K), lambda i: (i, 0)),
                # Weight / params have constant index maps -> stay resident.
                pl.BlockSpec((K, Dp), lambda i: (0, 0)),
                pl.BlockSpec((1, Dp), lambda i: (0, 0)),
                pl.BlockSpec((1, Dp), lambda i: (0, 0)),
                pl.BlockSpec((1, Dp), lambda i: (0, 0)),
            ],
            out_specs=pl.BlockSpec((tm, Dp), lambda i: (i, 0)),
        ),
        compiler_params=pltpu.CompilerParams(
            dimension_semantics=("parallel",),
            vmem_limit_bytes=vmem_limit),
    )(patches, w_mat, b_row, g_row, beta_row)

    return out[:M, :D].reshape(B, L, D)


# ----------------------------- references -----------------------------------

def _reference_conv(x_nchw, conv_w, conv_b, ln_gamma, ln_beta, patch_size,
                    eps=1e-5):
    # Pure-JAX reference mirroring the PyTorch forward (f32 conv path).
    ph, pw = patch_size
    y = jax.lax.conv_general_dilated(
        x_nchw, conv_w, window_strides=(ph, pw), padding="VALID",
        dimension_numbers=("NCHW", "OIHW", "NCHW"))
    y = y + conv_b[None, :, None, None]
    B, C, H, W = y.shape
    y = y.reshape(B, C, H * W).transpose(0, 2, 1)          # (B, L, D)
    mean = jnp.mean(y, axis=-1, keepdims=True)
    var = jnp.mean((y - mean) ** 2, axis=-1, keepdims=True)
    return (y - mean) / jnp.sqrt(var + eps) * ln_gamma + ln_beta


def _reference_matmul(x_nchw, conv_w, conv_b, ln_gamma, ln_beta, patch_size,
                      eps=1e-5, matmul_dtype=None):
    # Patch-matmul reference; optionally rounds matmul operands to bf16 to
    # match the kernel's MXU operand precision (f32 accumulation).
    ph, pw = patch_size
    B, C, H, W = x_nchw.shape
    D = conv_w.shape[0]
    Hp, Wp = H // ph, W // pw
    K = C * ph * pw
    p = x_nchw.reshape(B, C, Hp, ph, Wp, pw).transpose(0, 2, 4, 1, 3, 5)
    p = p.reshape(B * Hp * Wp, K)
    w = conv_w.reshape(D, K).T
    if matmul_dtype is not None:
        p = p.astype(matmul_dtype).astype(jnp.float32)
        w = w.astype(matmul_dtype).astype(jnp.float32)
    y = jnp.dot(p, w, preferred_element_type=jnp.float32) + conv_b[None, :]
    mean = jnp.mean(y, axis=-1, keepdims=True)
    var = jnp.mean((y - mean) ** 2, axis=-1, keepdims=True)
    y = (y - mean) / jnp.sqrt(var + eps) * ln_gamma[None, :] + ln_beta[None, :]
    return y.reshape(B, Hp * Wp, D)


if __name__ == "__main__":
    # Small shapes consistent with the module:
    #   image_resolution=(16,16), patch_size=4, in_channels=4, embed_dim=32, batch=2
    B, C, H, W = 2, 4, 16, 16
    patch_size = (4, 4)
    D = 32

    key = jax.random.PRNGKey(0)
    k_x, k_w, k_b, k_g, k_beta = jax.random.split(key, 5)

    x = jax.random.normal(k_x, (B, C, H, W), dtype=jnp.float32)
    conv_w = jax.random.normal(k_w, (D, C, patch_size[0], patch_size[1]),
                               dtype=jnp.float32) * 0.05
    conv_b = jax.random.normal(k_b, (D,), dtype=jnp.float32) * 0.01
    ln_gamma = jnp.ones((D,), jnp.float32) + 0.1 * jax.random.normal(k_g, (D,))
    ln_beta = 0.1 * jax.random.normal(k_beta, (D,))

    # tile_m=8 gives 4 pipelined grid steps even at this toy size (M = 32).
    out = patch_embeddings(x, conv_w, conv_b, ln_gamma, ln_beta, patch_size,
                           tile_m=8)
    out = jax.block_until_ready(out)

    L = (H // patch_size[0]) * (W // patch_size[1])
    assert out.shape == (B, L, D)

    # Tight check vs a reference using the same bf16 matmul operand precision.
    ref_bf16 = _reference_matmul(x, conv_w, conv_b, ln_gamma, ln_beta,
                                 patch_size, matmul_dtype=jnp.bfloat16)
    assert jnp.allclose(out, ref_bf16, atol=2e-3, rtol=2e-3), (
        "max |diff| vs bf16-matched ref = "
        + str(float(jnp.max(jnp.abs(out - ref_bf16)))))

    # Looser check vs the full-f32 PyTorch-semantics (conv-based) reference;
    # tolerance widened because matmul operands are bf16.
    ref_f32 = _reference_conv(x, conv_w, conv_b, ln_gamma, ln_beta, patch_size)
    assert jnp.allclose(out, ref_f32, atol=7.5e-2, rtol=7.5e-2), (
        "max |diff| vs f32 ref = "
        + str(float(jnp.max(jnp.abs(out - ref_f32)))))

    print("KERNEL_OK")
</pallas_src>

<mosaic_0001>
module attributes {stable_mosaic.version = 11 : i64} {
  func.func @_patch_embed_kernel(%arg0: i32, %arg1: memref<8x64xbf16, #tpu.memory_space<vmem>>, %arg2: memref<64x128xbf16, #tpu.memory_space<vmem>>, %arg3: memref<1x128xf32, #tpu.memory_space<vmem>>, %arg4: memref<1x128xf32, #tpu.memory_space<vmem>>, %arg5: memref<1x128xf32, #tpu.memory_space<vmem>>, %arg6: memref<8x128xf32, #tpu.memory_space<vmem>>) attributes {dimension_semantics = [#tpu.dimension_semantics<parallel>], iteration_bounds = array<i64: 4>, scalar_prefetch = 0 : i64, scratch_operands = 0 : i64, tpu.core_type = #tpu.core_type<tc>, window_params = [{transform_indices = @transform_0, window_bounds = array<i64: 8, 64>}, {pipeline_mode = #tpu.pipeline_mode<synchronous>, transform_indices = @transform_1, window_bounds = array<i64: 64, 128>}, {pipeline_mode = #tpu.pipeline_mode<synchronous>, transform_indices = @transform_2, window_bounds = array<i64: 1, 128>}, {pipeline_mode = #tpu.pipeline_mode<synchronous>, transform_indices = @transform_3, window_bounds = array<i64: 1, 128>}, {pipeline_mode = #tpu.pipeline_mode<synchronous>, transform_indices = @transform_4, window_bounds = array<i64: 1, 128>}, {transform_indices = @transform_5, window_bounds = array<i64: 8, 128>}]} {
    %c0 = arith.constant 0 : index
    %c0_0 = arith.constant 0 : index
    %0 = vector.load %arg1[%c0, %c0_0] : memref<8x64xbf16, #tpu.memory_space<vmem>>, vector<8x64xbf16>
    %c0_1 = arith.constant 0 : index
    %c0_2 = arith.constant 0 : index
    %1 = vector.load %arg2[%c0_1, %c0_2] : memref<64x128xbf16, #tpu.memory_space<vmem>>, vector<64x128xbf16>
    %cst = arith.constant dense<0.000000e+00> : vector<8x128xf32>
    %2 = tpu.matmul %0, %1, %cst {dimension_numbers = #tpu.dot_dimension_numbers<[1], [0], [0], [1], [0, 0, 1, 1], [], []>} : vector<8x64xbf16>, vector<64x128xbf16>, vector<8x128xf32> -> vector<8x128xf32>
    %c0_3 = arith.constant 0 : index
    %c0_4 = arith.constant 0 : index
    %3 = vector.load %arg3[%c0_3, %c0_4] : memref<1x128xf32, #tpu.memory_space<vmem>>, vector<1x128xf32>
    %4 = vector.broadcast %3 : vector<1x128xf32> to vector<8x128xf32>
    %5 = arith.addf %2, %4 : vector<8x128xf32>
    %cst_5 = arith.constant dense<0.000000e+00> : vector<8xf32>
    %6 = vector.multi_reduction <add>, %5, %cst_5 [1] : vector<8x128xf32> to vector<8xf32>
    %7 = vector.shape_cast %6 : vector<8xf32> to vector<8x1xf32>
    %cst_6 = arith.constant 3.125000e-02 : f32
    %8 = vector.broadcast %cst_6 : f32 to vector<8x1xf32>
    %9 = arith.mulf %7, %8 : vector<8x1xf32>
    %10 = arith.mulf %5, %5 : vector<8x128xf32>
    %cst_7 = arith.constant dense<0.000000e+00> : vector<8xf32>
    %11 = vector.multi_reduction <add>, %10, %cst_7 [1] : vector<8x128xf32> to vector<8xf32>
    %12 = vector.shape_cast %11 : vector<8xf32> to vector<8x1xf32>
    %cst_8 = arith.constant 3.125000e-02 : f32
    %13 = vector.broadcast %cst_8 : f32 to vector<8x1xf32>
    %14 = arith.mulf %12, %13 : vector<8x1xf32>
    %15 = arith.mulf %9, %9 : vector<8x1xf32>
    %16 = arith.subf %14, %15 : vector<8x1xf32>
    %cst_9 = arith.constant 0.000000e+00 : f32
    %17 = vector.broadcast %cst_9 : f32 to vector<8x1xf32>
    %18 = arith.maximumf %16, %17 : vector<8x1xf32>
    %cst_10 = arith.constant 9.99999974E-6 : f32
    %19 = vector.broadcast %cst_10 : f32 to vector<8x1xf32>
    %20 = arith.addf %18, %19 : vector<8x1xf32>
    %21 = math.rsqrt %20 : vector<8x1xf32>
    %22 = vector.broadcast %9 : vector<8x1xf32> to vector<8x128xf32>
    %23 = arith.subf %5, %22 : vector<8x128xf32>
    %24 = vector.broadcast %21 : vector<8x1xf32> to vector<8x128xf32>
    %25 = arith.mulf %23, %24 : vector<8x128xf32>
    %c0_11 = arith.constant 0 : index
    %c0_12 = arith.constant 0 : index
    %26 = vector.load %arg4[%c0_11, %c0_12] : memref<1x128xf32, #tpu.memory_space<vmem>>, vector<1x128xf32>
    %27 = vector.broadcast %26 : vector<1x128xf32> to vector<8x128xf32>
    %28 = arith.mulf %25, %27 : vector<8x128xf32>
    %c0_13 = arith.constant 0 : index
    %c0_14 = arith.constant 0 : index
    %29 = vector.load %arg5[%c0_13, %c0_14] : memref<1x128xf32, #tpu.memory_space<vmem>>, vector<1x128xf32>
    %30 = vector.broadcast %29 : vector<1x128xf32> to vector<8x128xf32>
    %31 = arith.addf %28, %30 : vector<8x128xf32>
    %c0_15 = arith.constant 0 : index
    %c0_16 = arith.constant 0 : index
    %32 = vector.load %arg6[%c0_15, %c0_16] : memref<8x128xf32, #tpu.memory_space<vmem>>, vector<8x128xf32>
    tpu.vector_store %arg6[%c0_15, %c0_16], %31 {strides = array<i32>} : memref<8x128xf32, #tpu.memory_space<vmem>>, vector<8x128xf32>,
    return
  }
  func.func @transform_0(%arg0: i32) -> (i32, i32) {
    %c0_i32 = arith.constant 0 : i32
    %c0_i32_0 = arith.constant 0 : i32
    return %arg0, %c0_i32 : i32, i32
  }
  func.func @transform_1(%arg0: i32) -> (i32, i32) {
    %c0_i32 = arith.constant 0 : i32
    %c0_i32_0 = arith.constant 0 : i32
    %c0_i32_1 = arith.constant 0 : i32
    return %c0_i32, %c0_i32_0 : i32, i32
  }
  func.func @transform_2(%arg0: i32) -> (i32, i32) {
    %c0_i32 = arith.constant 0 : i32
    %c0_i32_0 = arith.constant 0 : i32
    %c0_i32_1 = arith.constant 0 : i32
    return %c0_i32, %c0_i32_0 : i32, i32
  }
  func.func @transform_3(%arg0: i32) -> (i32, i32) {
    %c0_i32 = arith.constant 0 : i32
    %c0_i32_0 = arith.constant 0 : i32
    %c0_i32_1 = arith.constant 0 : i32
    return %c0_i32, %c0_i32_0 : i32, i32
  }
  func.func @transform_4(%arg0: i32) -> (i32, i32) {
    %c0_i32 = arith.constant 0 : i32
    %c0_i32_0 = arith.constant 0 : i32
    %c0_i32_1 = arith.constant 0 : i32
    return %c0_i32, %c0_i32_0 : i32, i32
  }
  func.func @transform_5(%arg0: i32) -> (i32, i32) {
    %c0_i32 = arith.constant 0 : i32
    %c0_i32_0 = arith.constant 0 : i32
    return %arg0, %c0_i32 : i32, i32
  }
}

</mosaic_0001>

<bundles_post_ra>
// kernel: tpu_custom_call.1
= control target key start
LH: loop header
LB: loop body
LE: loop exit
PB: predicated region body
PF: predicated region fallthrough
CT: control target
= control target key end

     0   :  { %10 = vsyncpa [#allocation3], 0  ;;  %s894_s0 = inlined_call_operand.hbm [shape: bf16[32,64], index: 0, kind: input, shape index: {}]   ;;  %s895_s1 = inlined_call_operand.hbm [shape: bf16[64,128], index: 1, kind: input, shape index: {}]   ;;  %s896_s2 = inlined_call_operand.vmem [shape: f32[1,128], index: 2, kind: input, shape index: {}]   ;;  %s897_s3 = inlined_call_operand.vmem [shape: f32[1,128], index: 3, kind: input, shape index: {}]   ;;  %s898_s4 = inlined_call_operand.vmem [shape: f32[1,128], index: 4, kind: input, shape index: {}]   ;;  %s899_s5 = inlined_call_operand.hbm [shape: f32[32,128], index: 5, kind: output, shape index: {}]  }
   0x1   :  { %12 = vsyncpa [#allocation3 + $0x1], 0 }
   0x2   :  { %13 = vsyncpa [#allocation6], 0 }
   0x3   :  { %14 = vsyncpa [#allocation4], 0 }
   0x4   :  { %16 = vsyncpa [#allocation4 + $0x1], 0  ;;  %s732_s18 = smov 0   ;;  %s734_s19 = smov 0  }
   0x5   :  { %s736_s20 = smov 0   ;;  %s738_s21 = smov 0  }
   0x6 LB: > { %s753_s22 = sadd.s32 4294967295, %s693_s21   ;;  %s465_s23 = sadd.s32 4294967294, %s693_s21   ;;  %s693_s21 = sphi %s738_s21, %s920_s21   ;;  %s689_s20 = sphi %s736_s20, %s919_s20   ;;  %s685_s19 = sphi %s734_s19, %s918_s19   ;;  %s681_s18 = sphi %s732_s18, %s917_s18  }
   0x7   : > { %p42_p0 = scmp.ne.s32.totalorder %s685_s19, %s681_s18  ;;  %p900_p1 = scmp.eq.s32.totalorder %s753_s22, 0 }
   0x8   : > { %p156_p3 = scmp.eq.s32.totalorder %s465_s23, 3  ;;  %p466_p5 = scmp.ge.s32.totalorder %s693_s21, 1 }
   0x9   : > { %p762_p4 = por %p900_p1, %p42_p0  ;;  %p163_p7 = scmp.lt.s32.totalorder %s693_s21, 5 }
   0xa   : > { %p767_p6 = por %p156_p3, %p42_p0  ;;  %s695_s27 = smov [#allocation5]  }
   0xb   : > { %s904_s24 = scalar_select %p762_p4, 1, 0 }
   0xc   : > { %s905_s25 = scalar_select %p767_p6, 1, 0 }
   0xd   : > { %p772_p8 = pnand %p466_p5, %p163_p7  ;;  %s175_s28 = sshll.u32 %s695_s27, 4  ;;  %s176_s28 = int_to_ptr.vmem [resolvable:$true] %s175_s28 }
   0xe   : > { %s785_s30 = sadd.s32 1, %s693_s21   ;;  %s29_s6 = sadd.s32 1, %s689_s20 }
   0xf   : > { %s906_s26 = scalar_select %p772_p8, 1, 0 }
  0x10   : > { %p512_p9 = pneg %p772_p8  ;;  %s26_s7 = ssub.s32 %s693_s21, %s785_s30 }
  0x11   : > { %s582_s8 = scalar_lea.vmem %s176_s28, 512  ;;  %p590_p3 = scmp.lt.s32.totalorder %s176_s28, %s176_s28 }
  0x12   : > { %p780_p10 = pnand %p512_p9, %p900_p1  ;;  %p583_p12 = scmp.ne.s32.totalorder %s176_s28, %s582_s8 }
  0x13   : > { %p591_p5 = scmp.lt.s32.totalorder %s582_s8, %s582_s8 }
  0x14   : > { %p573_p11 = pneg %p780_p10 }
  0x15   : > { %p592_p7 = por %p591_p5, %p590_p3 }
  0x16   : > { %p585_p13 = pnand %p583_p12, %p573_p11 }
  0x18   : > { %p586_p0 = pneg %p585_p13 }
  0x1a   : > { %p593_p2 = pnand %p592_p7, %p586_p0 }
  0x1c   : > { %596 = shalt.err (!%p593_p2)
}
  0x1d   : > { %s696_s9 = smov 64   ;;  %s697_s10 = smov 4  }
  0x1e   : > { %515 = dma.hbm_to_vmem [thread:$0]  (!%p780_p10), %s895_s1, 512, %s176_s28, [#allocation6], %s696_s9, %s696_s9, %s697_s10  }
  0x1f   : > { %p27_p9 = scmp.eq.s32.totalorder %s26_s7, 0  ;;  %p36_p11 = scmp.ne.s32.totalorder %s689_s20, %s685_s19 }
  0x20   : > { %p37_p12 = scmp.eq.s32.totalorder %s693_s21, 0  ;;  %p525_p2 = scmp.lt.s32.totalorder %s693_s21, 4 }
  0x21   : > { %s802_s13 = scalar_select %p27_p9, %s689_s20, %s29_s6  }
  0x22   : > { %p38_p13 = por %p37_p12, %p36_p11  ;;  %p908_p0 = scmp.eq.s32.totalorder %s753_s22, 3 }
  0x23   : > { %s198_s15 = sand.u32 1, %s689_s20   ;;  %s470_s16 = sshll.u32 %s693_s21, 6 }
  0x24   : > { %p806_p3 = por %p908_p0, %p36_p11  ;;  %s469_s17 = sshll.u32 %s198_s15, 2 }
  0x25   : > { %s815_s29 = scalar_lea.hbm %s894_s0, %s470_s16  ;;  %s202_s28 = scalar_lea.vmem [#allocation2], %s469_s17 }
  0x26   : > { %s909_s14 = scalar_select %p806_p3, 1, 0 }
  0x27   : > { %s209_s6 = sshll.u32 %s202_s28, 4  ;;  %p817_p10 = pnand %p525_p2, %p38_p13  ;;  %s210_s6 = int_to_ptr.vmem [resolvable:$true] %s209_s6 }
  0x28   : > { %s199_s8 = scalar_lea.sflag [#allocation3], %s198_s15  ;;  %s597_s9 = scalar_lea.hbm %s815_s29, 64 }
  0x29   : > { %p598_p5 = scmp.ne.s32.totalorder %s815_s29, %s597_s9  ;;  %p599_p7 = pneg %p817_p10 }
  0x2a   : > { %s602_s12 = scalar_lea.hbm %s894_s0, 256  ;;  %p603_p12 = scmp.lt.s32.totalorder %s815_s29, %s894_s0 }
  0x2b   : > { %p600_p9 = pnand %p599_p7, %p598_p5  ;;  %p604_p2 = scmp.lt.s32.totalorder %s602_s12, %s597_s9 }
  0x2d   : > { %p601_p11 = pneg %p600_p9  ;;  %p605_p13 = por %p604_p2, %p603_p12 }
  0x2f   : > { %p606_p0 = pnand %p605_p13, %p601_p11 }
  0x31   : > { %609 = shalt.err (!%p606_p0)
}
  0x32   : > { %s610_s23 = scalar_lea.vmem %s210_s6, 64  ;;  %s698_s15 = smov [#allocation2]  }
  0x33   : > { %p611_p1 = scmp.ne.s32.totalorder %s210_s6, %s610_s23  ;;  %s615_s27 = sshll.u32 %s698_s15, 4  ;;  %s616_s27 = int_to_ptr.vmem [resolvable:$false] %s615_s27 }
  0x34   : > { %s617_s28 = scalar_lea.vmem %s616_s27, 128  ;;  %p618_p5 = scmp.lt.s32.totalorder %s210_s6, %s616_s27 }
  0x35   : > { %p613_p6 = pnand %p611_p1, %p599_p7  ;;  %p619_p9 = scmp.lt.s32.totalorder %s617_s28, %s610_s23 }
  0x37   : > { %p614_p3 = pneg %p613_p6  ;;  %p620_p4 = por %p619_p9, %p618_p5 }
  0x39   : > { %p621_p8 = pnand %p620_p4, %p614_p3 }
  0x3b   : > { %624 = shalt.err (!%p621_p8)
}
  0x3c   : > { %519 = dma.hbm_to_vmem [thread:$0]  (!%p817_p10), %s815_s29, 64, %s210_s6, %s199_s8  }
  0x3d   : > { %p911_p11 = scmp.ne.s32.totalorder %s906_s26, 0 }
  0x3e   : > { %s838_s9 = sand.u32 (!%p911_p11), 1, %s685_s19   ;;  %p912_p1 = scmp.ne.s32.totalorder (!%p911_p11), %s904_s24, 0 }
  0x3f   : > { %218 = sbr.rel (%p911_p11) target bundleno = 467 (0x1d3), region = 40  ;;  %s472_s10 = sshll.u32 (!%p911_p11), %s838_s9, 2 }
  0x40   : > { %s221_s11 = scalar_lea.sflag (!%p911_p11), [#allocation3], %s838_s9  ;;  %s224_s12 = scalar_lea.vmem (!%p911_p11), [#allocation2], %s472_s10 }
  0x44   : > { %668 = dma.done.wait (%p912_p1), %s221_s11, 64  }
  0x45   : > { %670 = vsyncadd (%p912_p1), %s221_s11, 4294967232  ;;  %p913_p4 = scmp.eq.s32.totalorder %s753_s22, 0 }
  0x47   : > { %672 = dma.done.wait (%p913_p4), [#allocation6], 512   ;;  %p914_p6 = pmov %p913_p4 }
  0x48   : > { %v699_v0 = vmov 0.0   ;;  %vm700_vm0 = vmmov 0   ;;  %v565_v1 = vld [vmem:[#allocation5 + $0x18] sm:$0xff]   ;;  %v566_v2 = vld [vmem:[#allocation5 + $0x10] sm:$0xff]   ;;  %v567_v3 = vld [vmem:[#allocation5 + $0x8] sm:$0xff]   ;;  %vm296_vm1 = vcmask 523264  }
  0x49   : > { %674 = vsyncadd (%p914_p6), [#allocation6], 4294966784  ;;  %492 = vmatprep.subr.bf16.mxu0 %v699_v0  ;;  %500 = vmatprep.mubr.msk.bf16.mxu0 %vm700_vm0, %v699_v0  ;;  %v568_v4 = vld [vmem:[#allocation5] sm:$0xff]   ;;  %v256_v5 = vld [vmem:[%s224_s12] sm:$0xf]  ;;  %s474_s29 = sshll.u32 %s838_s9, 3 }
  0x4a   : > { %493 = vmatpush3.bf16.msra.mxu0 %v565_v1  ;;  %v475_v6 = vld [vmem:[%s896_s2] ss:$0 sm:$0xff]  ;;  %s484_s17 = sshll.u32 %s753_s22, 7  ;;  %s254_s23 = scalar_lea.vmem [#allocation7], %s474_s29 }
  0x4b   : > { %494 = vmatprep.subr.bf16.mxu0 %v699_v0  ;;  %v481_v23 = vld [vmem:[%s897_s3] ss:$0 sm:$0xff]  ;;  %s385_s15 = sshll.u32 %s254_s23, 4  ;;  %s383_s10 = scalar_lea.hbm %s899_s5, %s484_s17  ;;  %s386_s15 = int_to_ptr.vmem [resolvable:$true] %s385_s15 }
  0x4c   : > { %v482_v25 = vld [vmem:[%s898_s4] ss:$0 sm:$0xff]  ;;  %s372_s11 = scalar_lea.sflag [#allocation4], %s838_s9  ;;  %s625_s12 = scalar_lea.vmem %s386_s15, 128 }
  0x4d   : > { %p626_p8 = scmp.ne.s32.totalorder %s386_s15, %s625_s12  ;;  %p915_p3 = scmp.ne.s32.totalorder %s909_s14, 0 }
  0x4e   : > { %495 = vmatpush3.bf16.msra.mxu0 %v566_v2  ;;  %s701_s24 = smov [#allocation7]  }
  0x4f   : > { %496 = vmatprep.subr.bf16.mxu0 %v699_v0  ;;  %p627_p10 = pnand %p626_p8, %p915_p3  ;;  %s629_s26 = sshll.u32 %s701_s24, 4  ;;  %s630_s26 = int_to_ptr.vmem [resolvable:$false] %s629_s26 }
  0x50   : > { %s631_s22 = scalar_lea.vmem %s630_s26, 256  ;;  %p632_p12 = scmp.lt.s32.totalorder %s386_s15, %s630_s26 }
  0x51   : > { %p628_p7 = pneg %p627_p10  ;;  %p633_p2 = scmp.lt.s32.totalorder %s631_s22, %s625_s12 }
  0x52   : > { %497 = vmatpush3.bf16.msra.mxu0 %v567_v3 }
  0x53   : > { %498 = vmatprep.subr.bf16.mxu0 %v699_v0  ;;  %p634_p13 = por %p633_p2, %p632_p12 }
  0x55   : > { %p635_p0 = pnand %p634_p13, %p628_p7 }
  0x56   : > { %499 = vmatpush3.bf16.msra.mxu0 %v568_v4 }
  0x59   : > { %501 = vmatmul.mubr.msk.bf16.vlgmr.msra.gmra.mxu0 %vm296_vm1, %v256_v5 }
 0x119   : > { %v334_v7 = vpop.f32.mrf.mxu0 }
 0x11a   : > { %v335_v8 = vadd.f32 %v475_v6, %v334_v7 }
 0x11b   : > { %v502_v9 = vpop.f32.mrf.mxu0 }
 0x11c   : > { %340 = vadd.xlane.f32.xlu0 %v335_v8  ;;  %v343_v11 = vmul.f32 %v335_v8, %v335_v8 }
 0x11d   : > { %v337_v10 = vpop.f32.mrf.mxu0 }
 0x11f   : > { %v503_v12 = vpop.f32.mrf.mxu0 }
 0x120   : > { %344 = vadd.xlane.f32.xlu0 %v343_v11 }
 0x1a5   : > { %v341_v13 = vpop.xlane.xlu0 %340 }
 0x1a6   : > { %v342_v14 = vmul.f32 0.03125, %v341_v13 }
 0x1a8   : > { %v347_v16 = vmul.f32 %v342_v14, %v342_v14  ;;  %v352_v21 = vsub.f32 %v335_v8, %v342_v14 }
 0x1a9   : > { %v345_v15 = vpop.xlane.xlu0 %344 }
 0x1aa   : > { %v346_v17 = vmul.f32 0.03125, %v345_v15 }
 0x1ac   : > { %v348_v18 = vsub.f32 %v346_v17, %v347_v16 }
 0x1ae   : > { %v349_v19 = vmax.f32 %v348_v18, 0.0 }
 0x1b0   : > { %v350_v20 = vadd.f32 1e-05, %v349_v19 }
 0x1b2   : > { %569 = vrsqrt.f32 %v350_v20 }
 0x1bf   : > { %v570_v22 = vpop.eup %569 }
 0x1c0   : > { %v353_v24 = vmul.f32 %v570_v22, %v352_v21 }
 0x1c2   : > { %v361_v26 = vmul.f32 %v481_v23, %v353_v24 }
 0x1c4   : > { %v369_v27 = vadd.f32 %v482_v25, %v361_v26 }
 0x1c6   : > { %370 = vst [vmem:[%s254_s23] sm:$0xff] %v369_v27 }
 0x1c7   : > { %638 = shalt.err (!%p635_p0)
}
 0x1c8   : > { %s639_s29 = scalar_lea.hbm %s383_s10, 128  ;;  %s643_s7 = scalar_lea.hbm %s899_s5, 512 }
 0x1c9   : > { %p640_p5 = scmp.ne.s32.totalorder %s383_s10, %s639_s29  ;;  %p644_p1 = scmp.lt.s32.totalorder %s383_s10, %s899_s5 }
 0x1ca   : > { %p645_p4 = scmp.lt.s32.totalorder %s643_s7, %s639_s29 }
 0x1cb   : > { %p641_p9 = pnand %p640_p5, %p915_p3 }
 0x1cc   : > { %p646_p6 = por %p645_p4, %p644_p1 }
 0x1cd   : > { %p642_p11 = pneg %p641_p9 }
 0x1cf   : > { %p647_p8 = pnand %p646_p6, %p642_p11 }
 0x1d1   : > { %650 = shalt.err (!%p647_p8)
}
 0x1d2   : > { %510 = dma.vmem_to_hbm [thread:$0]  (%p915_p3), %s386_s15, 128, %s383_s10, %s372_s11  }
 0x1d3 PF: > { %p527_p10 = scmp.ge.s32.totalorder %s693_s21, 2  ;;  %s397_s17 = sand.u32 1, %s681_s18  }
 0x1d4   : > { %p916_p7 = scmp.ne.s32.totalorder %s905_s25, 0  ;;  %s398_s23 = scalar_lea.sflag [#allocation4], %s397_s17 }
 0x1d6   : > { %p521_p12 = pnand %p527_p10, %p916_p7 }
 0x1d8   : > { %p522_p2 = pneg %p521_p12 }
 0x1da   : > { %676 = dma.done.wait (%p522_p2), %s398_s23, 128  }
 0x1db   : > { %678 = vsyncadd (%p522_p2), %s398_s23, 4294967168  ;;  %p19_p13 = scmp.ge.s32.totalorder %s785_s30, 6   ;;  %s917_s18 = smov %s685_s19 }
 0x1dc   : > { %s918_s19 = smov %s689_s20  ;;  %s919_s20 = smov %s802_s13 }
 0x1dd   : > { %s920_s21 = smov %s785_s30  ;;  %21 = sbr.rel (!%p19_p13) target bundleno = 6 (0x6), region = 89 }
 0x1e2   :  { %403 = vsyncpa [#allocation3], 1 }
 0x1e3   :  { %405 = vsyncpa [#allocation3 + $0x1], 1 }
 0x1e4   :  { %406 = vsyncpa [#allocation6], 1 }
 0x1e5   :  { %407 = vsyncpa [#allocation4], 1 }
 0x1e6   :  { %409 = vsyncpa [#allocation4 + $0x1], 1 }

</bundles_post_ra>
